<compile_context>
chip_gen: v7x
topology: tpu7x:2x2x1
jax: 0.10.0
libtpu: 0.0.40
codegen_flags: <defaults>
</compile_context>

<pallas_src>
import functools

import jax
import jax.numpy as jnp
from jax import lax
from jax.experimental import pallas as pl
from jax.experimental.pallas import tpu as pltpu


def _conv2d_kernel(x_ref, w_ref, b_ref, o_ref, *, kh_sz, kw_sz, stride, th, w_out):
    """One (batch, output-row-tile) block.

    x_ref: (1, 1, SPAN, W_pad, C_in)   padded input rows for this tile (+halo)
    w_ref: (C_out, KH*KW*C_in)         im2col-folded weights
    b_ref: (C_out, 1)                  bias (f32)
    o_ref: (1, 1, C_out, TH*W_out)     lane-dense output tile
    """
    c_in = x_ref.shape[-1]
    c_out = w_ref.shape[0]

    # im2col of the row tile: KH*KW shifted slices concatenated along the
    # channel (lane) axis.  One structured relayout per grid step instead of
    # KH*KW per-tap reshapes, and the contraction depth grows to KH*KW*C_in.
    taps = []
    for kh in range(kh_sz):
        for kw in range(kw_sz):
            if stride == 1:
                taps.append(x_ref[0, 0, kh:kh + th, kw:kw + w_out, :])
            else:
                # Strided load straight from the ref (no load-then-gather).
                taps.append(x_ref[0, 0,
                                  pl.ds(kh, th, stride),
                                  pl.ds(kw, w_out, stride), :])
    patch = jnp.concatenate(taps, axis=-1)                    # (TH, W_out, K)
    patch = patch.reshape(th * w_out, kh_sz * kw_sz * c_in)   # leading-dim merge

    # Single MXU matmul contracting the folded tap/channel axis of both sides
    # (same q @ k.T-style dimension numbers used in attention kernels).
    # Result layout: channels on sublanes, flattened spatial on lanes, so the
    # store below is an unmasked, lane-dense vst and needs no reshape.
    acc = lax.dot_general(
        w_ref[...], patch,
        dimension_numbers=(((1,), (1,)), ((), ())),
        preferred_element_type=jnp.float32)                   # (C_out, TH*W_out)
    acc = acc + b_ref[...]                                    # f32 bias add
    o_ref[...] = acc.reshape(1, 1, c_out, th * w_out).astype(o_ref.dtype)


def _largest_divisor_at_most(n, cap):
    cap = int(max(1, min(n, cap)))
    for d in range(cap, 0, -1):
        if n % d == 0:
            return d
    return 1


def _pick_row_tile(h_out, w_out, w_pad, c_in, c_out, kh, kw, stride,
                   in_itemsize, requested, budget_bytes):
    """Largest divisor of H_out whose per-step working set fits the budget."""
    cap = requested if requested is not None else max(1, 512 // max(1, w_out))
    th = _largest_divisor_at_most(h_out, cap)
    while th > 1:
        span = (th - 1) * stride + kh
        in_tile = span * w_pad * c_in * in_itemsize            # input rows + halo
        out_tile = th * w_out * c_out * 4                      # output tile
        patch = th * w_out * kh * kw * c_in * in_itemsize      # im2col block
        acc = th * w_out * c_out * 4                           # f32 accumulator
        if 2 * (in_tile + out_tile) + patch + acc <= budget_bytes:
            break
        th = _largest_divisor_at_most(h_out, th - 1)
    return th


def conv2d(x, weight, bias, *, stride=1, padding=1, row_tile=None,
           mxu_dtype=None, vmem_limit_bytes=32 * 1024 * 1024):
    """Forward of nn.Conv2d.

    x:      (N, C_in, H, W)        NCHW, like PyTorch
    weight: (C_out, C_in, KH, KW)  OIHW, like PyTorch
    bias:   (C_out,)
    mxu_dtype: optional compute dtype for the MXU (e.g. jnp.bfloat16);
               accumulation and bias add stay in f32, output keeps x.dtype.
    returns (N, C_out, H_out, W_out)
    """
    n, c_in, h, w = x.shape
    c_out, c_in_w, kh, kw = weight.shape
    assert c_in_w == c_in  # TODO(synk): groups / dilation not supported.

    out_dtype = x.dtype
    compute_dtype = mxu_dtype if mxu_dtype is not None else x.dtype
    in_itemsize = jnp.dtype(compute_dtype).itemsize

    # NHWC internally (channels on lanes); pad spatial once (small halo only).
    x_nhwc = jnp.transpose(x, (0, 2, 3, 1)).astype(compute_dtype)
    x_pad = jnp.pad(
        x_nhwc, ((0, 0), (padding, padding), (padding, padding), (0, 0)))

    h_pad, w_pad = h + 2 * padding, w + 2 * padding
    h_out = (h_pad - kh) // stride + 1
    w_out = (w_pad - kw) // stride + 1

    # im2col-folded weights: (C_out, KH*KW*C_in), feature order (kh, kw, ci)
    # matching the kernel's tap-concat order.
    w_t = (jnp.transpose(weight, (0, 2, 3, 1))
           .reshape(c_out, kh * kw * c_in).astype(compute_dtype))
    b_col = bias.reshape(c_out, 1).astype(jnp.float32)

    th = _pick_row_tile(h_out, w_out, w_pad, c_in, c_out, kh, kw, stride,
                        in_itemsize, row_tile,
                        budget_bytes=max(4 * 1024 * 1024, vmem_limit_bytes // 3))
    nt = h_out // th
    span = (th - 1) * stride + kh

    # Overlapping row blocks (halo duplicated once) so the BlockSpec stays a
    # plain Blocked tiling and per-step VMEM is bounded.
    x_split = jnp.stack(
        [x_pad[:, t * th * stride: t * th * stride + span] for t in range(nt)],
        axis=1)                                    # (N, NT, SPAN, W_pad, C_in)

    kernel = functools.partial(_conv2d_kernel, kh_sz=kh, kw_sz=kw,
                               stride=stride, th=th, w_out=w_out)

    flops = 2 * n * h_out * w_out * c_out * kh * kw * c_in
    bytes_accessed = int(x_split.size * x_split.dtype.itemsize
                         + w_t.size * w_t.dtype.itemsize
                         + b_col.size * 4
                         + n * h_out * w_out * c_out * jnp.dtype(out_dtype).itemsize)

    out = pl.pallas_call(
        kernel,
        out_shape=jax.ShapeDtypeStruct((n, nt, c_out, th * w_out), out_dtype),
        grid_spec=pltpu.PrefetchScalarGridSpec(
            num_scalar_prefetch=0,
            grid=(n, nt),
            in_specs=[
                pl.BlockSpec((1, 1, span, w_pad, c_in),
                             lambda b, t: (b, t, 0, 0, 0)),
                pl.BlockSpec((c_out, kh * kw * c_in), lambda b, t: (0, 0)),
                pl.BlockSpec((c_out, 1), lambda b, t: (0, 0)),
            ],
            out_specs=pl.BlockSpec((1, 1, c_out, th * w_out),
                                   lambda b, t: (b, t, 0, 0)),
        ),
        compiler_params=pltpu.CompilerParams(
            dimension_semantics=("parallel", "parallel"),
            vmem_limit_bytes=vmem_limit_bytes,
        ),
        cost_estimate=pl.CostEstimate(flops=flops, transcendentals=0,
                                      bytes_accessed=bytes_accessed),
    )(x_split, w_t, b_col)

    # (N, NT, C_out, TH*W_out) -> (N, C_out, H_out, W_out)
    out = out.reshape(n, nt, c_out, th, w_out)
    out = jnp.transpose(out, (0, 2, 1, 3, 4)).reshape(n, c_out, h_out, w_out)
    return out


if __name__ == "__main__":
    key = jax.random.PRNGKey(0)
    kx, kw_key, kb = jax.random.split(key, 3)

    # Shapes consistent with the module: batch=2, C_in=4, 16x16 spatial,
    # C_out=8, kernel_size=3, padding=1, stride=1.
    N, C_IN, H, W = 2, 4, 16, 16
    C_OUT, K = 8, 3

    x = jax.random.normal(kx, (N, C_IN, H, W), dtype=jnp.float32)
    weight = jax.random.normal(kw_key, (C_OUT, C_IN, K, K), dtype=jnp.float32) * 0.1
    bias = jax.random.normal(kb, (C_OUT,), dtype=jnp.float32)

    # Pure-JAX reference convolution.
    y_ref = lax.conv_general_dilated(
        x, weight,
        window_strides=(1, 1),
        padding=((1, 1), (1, 1)),
        dimension_numbers=("NCHW", "OIHW", "NCHW"),
    ) + bias.reshape(1, C_OUT, 1, 1)

    # bf16-on-MXU path (per perf review) with explicit output-row tiling.
    y_bf16 = conv2d(x, weight, bias, stride=1, padding=1,
                    row_tile=8, mxu_dtype=jnp.bfloat16)
    jax.block_until_ready(y_bf16)
    assert y_bf16.shape == y_ref.shape and y_bf16.dtype == x.dtype
    assert bool(jnp.allclose(y_bf16, y_ref, rtol=3e-2, atol=3e-2)), \
        "Conv2d kernel (bf16 MXU) mismatch"

    # Exact f32 path with auto row-tile selection.
    y_f32 = conv2d(x, weight, bias, stride=1, padding=1)
    jax.block_until_ready(y_f32)
    assert y_f32.shape == y_ref.shape and y_f32.dtype == x.dtype
    assert bool(jnp.allclose(y_f32, y_ref, rtol=1e-4, atol=1e-4)), \
        "Conv2d kernel (f32) mismatch"

    print("KERNEL_OK")
</pallas_src>

<mosaic_0001>
module attributes {stable_mosaic.version = 11 : i64} {
  func.func @_conv2d_kernel(%arg0: i32, %arg1: i32, %arg2: memref<1x1x10x18x4xbf16, #tpu.memory_space<vmem>>, %arg3: memref<8x36xbf16, #tpu.memory_space<vmem>>, %arg4: memref<8x1xf32, #tpu.memory_space<vmem>>, %arg5: memref<1x1x8x128xf32, #tpu.memory_space<vmem>>) attributes {dimension_semantics = [#tpu.dimension_semantics<parallel>, #tpu.dimension_semantics<parallel>], iteration_bounds = array<i64: 2, 2>, scalar_prefetch = 0 : i64, scratch_operands = 0 : i64, tpu.core_type = #tpu.core_type<tc>, window_params = [{transform_indices = @transform_0, window_bounds = array<i64: 1, 1, 10, 18, 4>}, {pipeline_mode = #tpu.pipeline_mode<synchronous>, transform_indices = @transform_1, window_bounds = array<i64: 8, 36>}, {pipeline_mode = #tpu.pipeline_mode<synchronous>, transform_indices = @transform_2, window_bounds = array<i64: 8, 1>}, {transform_indices = @transform_3, window_bounds = array<i64: 1, 1, 8, 128>}]} {
    %c0 = arith.constant 0 : index
    %c0_0 = arith.constant 0 : index
    %c0_1 = arith.constant 0 : index
    %c0_2 = arith.constant 0 : index
    %c0_3 = arith.constant 0 : index
    %0 = vector.load %arg2[%c0, %c0_0, %c0_1, %c0_2, %c0_3] : memref<1x1x10x18x4xbf16, #tpu.memory_space<vmem>>, vector<1x1x8x16x4xbf16>
    %1 = vector.shape_cast %0 : vector<1x1x8x16x4xbf16> to vector<8x16x4xbf16>
    %c0_4 = arith.constant 0 : index
    %c0_5 = arith.constant 0 : index
    %c0_6 = arith.constant 0 : index
    %c1 = arith.constant 1 : index
    %c0_7 = arith.constant 0 : index
    %2 = vector.load %arg2[%c0_4, %c0_5, %c0_6, %c1, %c0_7] : memref<1x1x10x18x4xbf16, #tpu.memory_space<vmem>>, vector<1x1x8x16x4xbf16>
    %3 = vector.shape_cast %2 : vector<1x1x8x16x4xbf16> to vector<8x16x4xbf16>
    %c0_8 = arith.constant 0 : index
    %c0_9 = arith.constant 0 : index
    %c0_10 = arith.constant 0 : index
    %c2 = arith.constant 2 : index
    %c0_11 = arith.constant 0 : index
    %4 = vector.load %arg2[%c0_8, %c0_9, %c0_10, %c2, %c0_11] : memref<1x1x10x18x4xbf16, #tpu.memory_space<vmem>>, vector<1x1x8x16x4xbf16>
    %5 = vector.shape_cast %4 : vector<1x1x8x16x4xbf16> to vector<8x16x4xbf16>
    %c0_12 = arith.constant 0 : index
    %c0_13 = arith.constant 0 : index
    %c1_14 = arith.constant 1 : index
    %c0_15 = arith.constant 0 : index
    %c0_16 = arith.constant 0 : index
    %6 = vector.load %arg2[%c0_12, %c0_13, %c1_14, %c0_15, %c0_16] : memref<1x1x10x18x4xbf16, #tpu.memory_space<vmem>>, vector<1x1x8x16x4xbf16>
    %7 = vector.shape_cast %6 : vector<1x1x8x16x4xbf16> to vector<8x16x4xbf16>
    %c0_17 = arith.constant 0 : index
    %c0_18 = arith.constant 0 : index
    %c1_19 = arith.constant 1 : index
    %c1_20 = arith.constant 1 : index
    %c0_21 = arith.constant 0 : index
    %8 = vector.load %arg2[%c0_17, %c0_18, %c1_19, %c1_20, %c0_21] : memref<1x1x10x18x4xbf16, #tpu.memory_space<vmem>>, vector<1x1x8x16x4xbf16>
    %9 = vector.shape_cast %8 : vector<1x1x8x16x4xbf16> to vector<8x16x4xbf16>
    %c0_22 = arith.constant 0 : index
    %c0_23 = arith.constant 0 : index
    %c1_24 = arith.constant 1 : index
    %c2_25 = arith.constant 2 : index
    %c0_26 = arith.constant 0 : index
    %10 = vector.load %arg2[%c0_22, %c0_23, %c1_24, %c2_25, %c0_26] : memref<1x1x10x18x4xbf16, #tpu.memory_space<vmem>>, vector<1x1x8x16x4xbf16>
    %11 = vector.shape_cast %10 : vector<1x1x8x16x4xbf16> to vector<8x16x4xbf16>
    %c0_27 = arith.constant 0 : index
    %c0_28 = arith.constant 0 : index
    %c2_29 = arith.constant 2 : index
    %c0_30 = arith.constant 0 : index
    %c0_31 = arith.constant 0 : index
    %12 = vector.load %arg2[%c0_27, %c0_28, %c2_29, %c0_30, %c0_31] : memref<1x1x10x18x4xbf16, #tpu.memory_space<vmem>>, vector<1x1x8x16x4xbf16>
    %13 = vector.shape_cast %12 : vector<1x1x8x16x4xbf16> to vector<8x16x4xbf16>
    %c0_32 = arith.constant 0 : index
    %c0_33 = arith.constant 0 : index
    %c2_34 = arith.constant 2 : index
    %c1_35 = arith.constant 1 : index
    %c0_36 = arith.constant 0 : index
    %14 = vector.load %arg2[%c0_32, %c0_33, %c2_34, %c1_35, %c0_36] : memref<1x1x10x18x4xbf16, #tpu.memory_space<vmem>>, vector<1x1x8x16x4xbf16>
    %15 = vector.shape_cast %14 : vector<1x1x8x16x4xbf16> to vector<8x16x4xbf16>
    %c0_37 = arith.constant 0 : index
    %c0_38 = arith.constant 0 : index
    %c2_39 = arith.constant 2 : index
    %c2_40 = arith.constant 2 : index
    %c0_41 = arith.constant 0 : index
    %16 = vector.load %arg2[%c0_37, %c0_38, %c2_39, %c2_40, %c0_41] : memref<1x1x10x18x4xbf16, #tpu.memory_space<vmem>>, vector<1x1x8x16x4xbf16>
    %17 = vector.shape_cast %16 : vector<1x1x8x16x4xbf16> to vector<8x16x4xbf16>
    %18 = tpu.concatenate %1, %3, %5, %7, %9, %11, %13, %15, %17 in 2 : vector<8x16x4xbf16>, vector<8x16x4xbf16>, vector<8x16x4xbf16>, vector<8x16x4xbf16>, vector<8x16x4xbf16>, vector<8x16x4xbf16>, vector<8x16x4xbf16>, vector<8x16x4xbf16>, vector<8x16x4xbf16> -> vector<8x16x36xbf16>
    %19 = vector.shape_cast %18 : vector<8x16x36xbf16> to vector<128x36xbf16>
    %c0_42 = arith.constant 0 : index
    %c0_43 = arith.constant 0 : index
    %20 = vector.load %arg3[%c0_42, %c0_43] : memref<8x36xbf16, #tpu.memory_space<vmem>>, vector<8x36xbf16>
    %cst = arith.constant dense<0.000000e+00> : vector<8x128xf32>
    %21 = tpu.matmul %20, %19, %cst {dimension_numbers = #tpu.dot_dimension_numbers<[1], [1], [0], [0], [0, 0, 1, 0], [], []>} : vector<8x36xbf16>, vector<128x36xbf16>, vector<8x128xf32> -> vector<8x128xf32>
    %c0_44 = arith.constant 0 : index
    %c0_45 = arith.constant 0 : index
    %22 = vector.load %arg4[%c0_44, %c0_45] : memref<8x1xf32, #tpu.memory_space<vmem>>, vector<8x1xf32>
    %23 = vector.broadcast %22 : vector<8x1xf32> to vector<8x128xf32>
    %24 = arith.addf %21, %23 : vector<8x128xf32>
    %25 = vector.shape_cast %24 : vector<8x128xf32> to vector<1x1x8x128xf32>
    %c0_46 = arith.constant 0 : index
    %c0_47 = arith.constant 0 : index
    %c0_48 = arith.constant 0 : index
    %c0_49 = arith.constant 0 : index
    %26 = vector.load %arg5[%c0_46, %c0_47, %c0_48, %c0_49] : memref<1x1x8x128xf32, #tpu.memory_space<vmem>>, vector<1x1x8x128xf32>
    tpu.vector_store %arg5[%c0_46, %c0_47, %c0_48, %c0_49], %25 {strides = array<i32>} : memref<1x1x8x128xf32, #tpu.memory_space<vmem>>, vector<1x1x8x128xf32>,
    return
  }
  func.func @transform_0(%arg0: i32, %arg1: i32) -> (i32, i32, i32, i32, i32) {
    %c0_i32 = arith.constant 0 : i32
    %c0_i32_0 = arith.constant 0 : i32
    %c0_i32_1 = arith.constant 0 : i32
    %c0_i32_2 = arith.constant 0 : i32
    return %arg0, %arg1, %c0_i32, %c0_i32_0, %c0_i32_1 : i32, i32, i32, i32, i32
  }
  func.func @transform_1(%arg0: i32, %arg1: i32) -> (i32, i32) {
    %c0_i32 = arith.constant 0 : i32
    %c0_i32_0 = arith.constant 0 : i32
    %c0_i32_1 = arith.constant 0 : i32
    return %c0_i32, %c0_i32_0 : i32, i32
  }
  func.func @transform_2(%arg0: i32, %arg1: i32) -> (i32, i32) {
    %c0_i32 = arith.constant 0 : i32
    %c0_i32_0 = arith.constant 0 : i32
    %c0_i32_1 = arith.constant 0 : i32
    return %c0_i32, %c0_i32_0 : i32, i32
  }
  func.func @transform_3(%arg0: i32, %arg1: i32) -> (i32, i32, i32, i32) {
    %c0_i32 = arith.constant 0 : i32
    %c0_i32_0 = arith.constant 0 : i32
    %c0_i32_1 = arith.constant 0 : i32
    return %arg0, %arg1, %c0_i32, %c0_i32_0 : i32, i32, i32, i32
  }
}

</mosaic_0001>

<bundles_post_ra>
// kernel: tpu_custom_call.1
= control target key start
LH: loop header
LB: loop body
LE: loop exit
PB: predicated region body
PF: predicated region fallthrough
CT: control target
= control target key end

     0   :  { %8 = vsyncpa [#allocation3], 0  ;;  %s2344_s0 = inlined_call_operand.vmem [shape: bf16[2,2,10,18,4], index: 0, kind: input, shape index: {}]   ;;  %s2345_s1 = inlined_call_operand.vmem [shape: bf16[8,36], index: 1, kind: input, shape index: {}]   ;;  %s2346_s2 = inlined_call_operand.vmem [shape: f32[8,1], index: 2, kind: input, shape index: {}]   ;;  %s2347_s3 = inlined_call_operand.hbm [shape: f32[2,2,8,128], index: 3, kind: output, shape index: {}]  }
   0x1   :  { %10 = vsyncpa [#allocation3 + $0x1], 0  ;;  %s1814_s12 = smov 0   ;;  %s1816_s13 = smov 0  }
   0x2   :  { %s1818_s14 = smov 0   ;;  %s1820_s15 = smov 0  }
   0x3   :  { %s1822_s16 = smov 0   ;;  %s1824_s17 = smov 0  }
   0x4   :  { %s1826_s18 = smov 0   ;;  %s1828_s19 = smov 0  }
   0x5 LB: > { %s1351_s20 = sadd.s32 4294967295, %s1780_s19   ;;  %s1352_s21 = sadd.s32 4294967294, %s1780_s19   ;;  %s1780_s19 = sphi %s1828_s19, %s16_s19   ;;  %s1776_s18 = sphi %s1826_s18, %s2356_s18   ;;  %s1772_s17 = sphi %s1824_s17, %s2355_s17   ;;  %s1768_s16 = sphi %s1822_s16, %s2354_s16   ;;  %s1764_s15 = sphi %s1820_s15, %s2353_s15   ;;  %s1760_s14 = sphi %s1818_s14, %s2352_s14   ;;  %s1756_s13 = sphi %s1816_s13, %s2351_s13   ;;  %s1752_s12 = sphi %s1814_s12, %s2350_s12  }
   0x6   : > { %s25_s22 = sadd.s32 1, %s1772_s17  ;;  %s28_s23 = sadd.s32 1, %s1776_s18 }
   0x7   : > { %p26_p0 = scmp.ge.s32.totalorder %s25_s22, 2  ;;  %p117_p1 = scmp.ne.s32.totalorder %s1760_s14, %s1756_s13 }
   0x8   : > { %p118_p2 = scmp.eq.s32.totalorder %s1351_s20, 3  ;;  %p123_p5 = scmp.ne.s32.totalorder %s1756_s13, %s1752_s12 }
   0x9   : > { %s2358_s22 = smov (%p26_p0, %s25_s22), 0  ;;  %s2360_s23 = smov (!%p26_p0, %s28_s23), %s1776_s18 }
   0xa   : > { %s103_s24 = ssub.s32 %s1772_s17, %s2358_s22  ;;  %p1865_p3 = por %p118_p2, %p117_p1 }
   0xb   : > { %p30_p4 = scmp.ge.s32.totalorder %s2360_s23, 2  ;;  %p124_p6 = scmp.eq.s32.totalorder %s1352_s21, 3 }
   0xc   : > { %p1355_p7 = scmp.ge.s32.totalorder %s1780_s19, 1  ;;  %p160_p9 = scmp.lt.s32.totalorder %s1780_s19, 5 }
   0xd   : > { %s2362_s23 = smov (%p30_p4, %s2360_s23), 0  ;;  %p1874_p8 = por %p124_p6, %p123_p5 }
   0xe   : > { %s102_s27 = ssub.s32 %s1776_s18, %s2362_s23  ;;  %s107_s28 = sadd.s32 1, %s1760_s14 }
   0xf   : > { %s104_s29 = sor.u32 %s103_s24, %s102_s27  ;;  %p161_p10 = pnand %p1355_p7, %p160_p9 }
  0x10   : > { %p105_p11 = scmp.eq.s32.totalorder %s104_s29, 0  ;;  %p188_p12 = scmp.lt.s32.totalorder (!%p161_p10), %s1768_s16, 1  ;;  %vm497_vm0 = vcmask (!%p161_p10), 1046528   ;;  %vm360_vm1 = vsmask.f32 (!%p161_p10), 7424  ;;  %vm1791_vm2 = vmmov (!%p161_p10), 0  }
  0x11   : > { %164 = sbr.rel (%p161_p10) target bundleno = 516 (0x204), region = 32  ;;  %p190_p13 = scmp.lt.s32.totalorder (!%p161_p10), %s1764_s15, 1  ;;  %vm1050_vm3 = vcmask (!%p161_p10), 31744   ;;  %vm1067_vm4 = vcmask (!%p161_p10), 64512   ;;  %vm1084_vm5 = vcmask (!%p161_p10), 97280   ;;  %vm1101_vm6 = vcmask (!%p161_p10), 130048  }
  0x12   : > { %s1883_s30 = scalar_select %p105_p11, %s1760_s14, %s107_s28  }
  0x13   : > { %s1782_s21 = smov (!%p161_p10), 12   ;;  %s1783_s24 = smov (!%p161_p10), 8   ;;  %vm1118_vm7 = vcmask (!%p161_p10), 162816   ;;  %vm1135_vm8 = vcmask (!%p161_p10), 195584   ;;  %vm1152_vm9 = vcmask (!%p161_p10), 228352   ;;  %vm1169_vm10 = vcmask (!%p161_p10), 261120  }
  0x14   : > { %s1784_s27 = smov (!%p161_p10), 24   ;;  %s1785_s28 = smov (!%p161_p10), 20   ;;  %vm1193_vm11 = vcmask (!%p161_p10), 293888  }
  0x15   : > { %s1786_s29 = smov (!%p161_p10), 32   ;;  %s185_s11 = sand.u32 (!%p161_p10), 1, %s1756_s13  }
  0x18   : > { %s189_s4 = scalar_select %p188_p12, %s1768_s16, 1 }
  0x19   : > { %s191_s5 = scalar_select %p190_p13, %s1764_s15, 1 }
  0x1a   : > { %s1530_s6 = smul.u32 60, %s189_s4  ;;  %s1787_s4 = smov 4  }
  0x1b   : > { %s1529_s7 = smul.u32 30, %s191_s5  ;;  %s1788_s5 = smov 28  }
  0x1d   : > { %s194_s8 = sadd.s32 %s1530_s6, %s1529_s7  ;;  %s1789_s6 = smov 16  }
  0x1e   : > { %s1357_s9 = sshll.u32 %s194_s8, 2  ;;  %s1793_s7 = smov [#allocation2]  }
  0x1f   : > { %s1892_s20 = scalar_lea.vmem %s2344_s0, %s1357_s9  ;;  %s1690_s8 = sshll.u32 %s1793_s7, 4  ;;  %s1691_s8 = int_to_ptr.vmem [resolvable:$false] %s1690_s8 }
  0x20   : > { %v1358_v0 = vld [vmem:[%s1892_s20 + $0xc] sm:$0xf]  ;;  %v1359_v1 = vld [vmem:[%s1892_s20 + $0x10] sm:$0xf]  ;;  %v199_v5 = vld [vmem:[%s1892_s20 + $0x4] sm:$0xf] }
  0x21   : > { %v1382_v2 = vld [vmem:[%s1892_s20 + $0xc] sm:$0xe]  ;;  %v1897_v3 = vcombine.low %v1358_v0, %v1359_v1  ;;  %v222_v6 = vld [vmem:[%s1892_s20] sm:$0xe]  ;;  %v1390_v12 = vld [vmem:[%s1892_s20 + $0x18] sm:$0xf] }
  0x22   : > { %v1462_v4 = vcombine.low %v1382_v2, %v1359_v1  ;;  %v1616_v7 = vld [vmem:[%s1892_s20 + $0x8] ss:$0 sps:$4 sm:$0x11]   ;;  %v1438_v8 = vcombine.low %v222_v6, %v199_v5  ;;  %v198_v9 = vld [vmem:[%s1892_s20] sm:$0xf]  ;;  %s1692_s9 = scalar_lea.vmem %s1691_s8, 256 }
  0x23   : > { %578 = vrot.lane.b32.xlu1 %v1897_v3, %s1782_s21  ;;  %v621_v10 = vshll.u32 %v1897_v3, 16  ;;  %v1906_v11 = vcombine.low %v198_v9, %v199_v5  ;;  %v1391_v13 = vld [vmem:[%s1892_s20 + $0x1c] sm:$0xf]  ;;  %v499_v16 = vrot.slane %v1616_v7, 1  ;;  %v1414_v17 = vld [vmem:[%s1892_s20 + $0x18] sm:$0xe] }
  0x24   : > { %v754_v14 = vrot.slane %v1462_v4, 1  ;;  %v498_v15 = vrot.slane %v1438_v8, 1  ;;  %v1470_v18 = vcombine.low %v1390_v12, %v1391_v13  ;;  %v1486_v19 = vcombine.low %v1414_v17, %v1391_v13  ;;  %v1621_v20 = vld [vmem:[%s1892_s20 + $0x14] ss:$0 sps:$4 sm:$0x11]  }
  0x25   : > { %v362_v21 = vshrl.u32 %v1906_v11, 16  ;;  %v1622_v24 = vld [vmem:[%s1892_s20 + $0x20] ss:$0 sps:$4 sm:$0x11]   ;;  %v364_v25 = vshll.u32 %v1906_v11, 16  ;;  %v369_v26 = vshll.u32 %v1616_v7, 16 }
  0x26   : > { %v500_v22 = vsel %vm497_vm0, %v498_v15, %v499_v16  ;;  %v877_v23 = vshll.u32 %v1470_v18, 16  ;;  %v755_v27 = vrot.slane %v1621_v20, 1  ;;  %v1010_v28 = vrot.slane %v1486_v19, 1  ;;  %v201_v29 = vld [vmem:[%s1892_s20 + $0x10] sm:$0xf] }
  0x27   : > { %522 = vrot.lane.b32.xlu0 %v500_v22, %s1783_s24  ;;  %834 = vrot.lane.b32.xlu1 %v1470_v18, %s1784_s27  ;;  %v1011_v30 = vrot.slane %v1622_v24, 1  ;;  %v366_v31 = vrot.slane %v364_v25, 1  ;;  %v371_v32 = vrot.slane %v369_v26, 1  ;;  %v223_v33 = vld [vmem:[%s1892_s20 + $0xc] sm:$0xe]  ;;  %v875_v34 = vshrl.u32 %v1470_v18, 16 }
  0x28   : > { %v756_v35 = vsel %vm497_vm0, %v754_v14, %v755_v27  ;;  %v1623_v36 = vld [vmem:[%s1892_s20 + $0x14] ss:$0 sps:$4 sm:$0x11]   ;;  %v1439_v37 = vcombine.low %v223_v33, %v201_v29  ;;  %v200_v38 = vld [vmem:[%s1892_s20 + $0xc] sm:$0xf]  ;;  %v879_v39 = vrot.slane %v877_v23, 1 }
  0x29   : > { %v1012_v40 = vsel %vm497_vm0, %v1010_v28, %v1011_v30  ;;  %v367_v41 = vor.u32 %v366_v31, %v362_v21  ;;  %v1924_v42 = vcombine.low %v200_v38, %v201_v29  ;;  %v882_v43 = vshll.u32 %v1622_v24, 16  ;;  %v1360_v44 = vld [vmem:[%s1892_s20 + $0x18] sm:$0xf]  ;;  %v1361_v49 = vld [vmem:[%s1892_s20 + $0x1c] sm:$0xf] }
  0x2a   : > { %v501_v45 = vrot.slane %v1439_v37, 1  ;;  %v502_v46 = vrot.slane %v1623_v36, 1  ;;  %v880_v47 = vor.u32 %v879_v39, %v875_v34  ;;  %v619_v48 = vshrl.u32 %v1897_v3, 16  ;;  %v1383_v54 = vld [vmem:[%s1892_s20 + $0x18] sm:$0xe] }
  0x2b   : > { %778 = vrot.lane.b32.xlu0 %v756_v35, %s1785_s28  ;;  %1034 = vrot.lane.b32.xlu1 %v1012_v40, %s1786_s29  ;;  %v372_v50 = vsel %vm360_vm1, %v367_v41, %v371_v32  ;;  %v884_v51 = vrot.slane %v882_v43, 1  ;;  %v623_v52 = vrot.slane %v621_v10, 1  ;;  %v626_v53 = vshll.u32 %v1621_v20, 16  ;;  %v1628_v59 = vld [vmem:[%s1892_s20 + $0x20] ss:$0 sps:$4 sm:$0x11]  }
  0x2c   : > { %v503_v55 = vsel %vm497_vm0, %v501_v45, %v502_v46  ;;  %v374_v56 = vshrl.u32 %v1924_v42, 16  ;;  %v376_v57 = vshll.u32 %v1924_v42, 16  ;;  %v381_v58 = vshll.u32 %v1623_v36, 16  ;;  %v1392_v63 = vld [vmem:[%s1892_s20 + $0x24] sm:$0xf] }
  0x2d   : > { %v624_v60 = vor.u32 %v623_v52, %v619_v48  ;;  %v628_v61 = vrot.slane %v626_v53, 1  ;;  %v1447_v62 = vcombine.low %v1360_v44, %v1361_v49  ;;  %v1393_v0 = vld [vmem:[%s1892_s20 + $0x28] sm:$0xf]  ;;  %v638_v3 = vshll.u32 %v1628_v59, 16  ;;  %v1415_v8 = vld [vmem:[%s1892_s20 + $0x24] sm:$0xe] }
  0x2e   : > { %v378_v1 = vrot.slane %v376_v57, 1  ;;  %v383_v2 = vrot.slane %v381_v58, 1  ;;  %v885_v4 = vsel %vm360_vm1, %v880_v47, %v884_v51  ;;  %v1463_v10 = vcombine.low %v1383_v54, %v1361_v49  ;;  %v1631_v13 = vld [vmem:[%s1892_s20 + $0x2c] ss:$0 sps:$4 sm:$0x11]  }
  0x2f   : > { %457 = vrot.lane.b32.xlu0 %v372_v50, %s1787_s4  ;;  %524 = vrot.lane.b32.xlu1 %v503_v55, %s1783_s24  ;;  %v629_v5 = vsel %vm360_vm1, %v624_v60, %v628_v61  ;;  %v633_v6 = vshll.u32 %v1447_v62, 16  ;;  %v631_v7 = vshrl.u32 %v1447_v62, 16  ;;  %v1471_v12 = vcombine.low %v1392_v63, %v1393_v0  ;;  %v202_v16 = vld [vmem:[%s1892_s20 + $0x18] sm:$0xf]  ;;  %v203_v17 = vld [vmem:[%s1892_s20 + $0x1c] sm:$0xf] }
  0x30   : > { %v379_v9 = vor.u32 %v378_v1, %v374_v56  ;;  %v640_v15 = vrot.slane %v638_v3, 1  ;;  %v1487_v19 = vcombine.low %v1415_v8, %v1393_v0  ;;  %v758_v22 = vrot.slane %v1628_v59, 1  ;;  %v224_v23 = vld [vmem:[%s1892_s20 + $0x18] sm:$0xe]  ;;  %v1362_v27 = vld [vmem:[%s1892_s20 + $0x24] sm:$0xf] }
  0x31   : > { %v635_v14 = vrot.slane %v633_v6, 1  ;;  %v889_v18 = vshll.u32 %v1471_v12, 16  ;;  %v757_v24 = vrot.slane %v1463_v10, 1  ;;  %v887_v25 = vshrl.u32 %v1471_v12, 16  ;;  %v1363_v28 = vld [vmem:[%s1892_s20 + $0x28] sm:$0xf] }
  0x32   : > { %v384_v20 = vsel %vm360_vm1, %v379_v9, %v383_v2  ;;  %v1951_v26 = vcombine.low %v202_v16, %v203_v17  ;;  %v894_v30 = vshll.u32 %v1631_v13, 16  ;;  %v1633_v31 = vld [vmem:[%s1892_s20 + $0x20] ss:$0 sps:$4 sm:$0x11]   ;;  %v1013_v33 = vrot.slane %v1487_v19, 1 }
  0x33   : > { %970 = vrot.lane.b32.xlu0 %v885_v4, %s1788_s5  ;;  %714 = vrot.lane.b32.xlu1 %v629_v5, %s1789_s6  ;;  %v636_v21 = vor.u32 %v635_v14, %v631_v7  ;;  %v891_v32 = vrot.slane %v889_v18, 1  ;;  %v1014_v34 = vrot.slane %v1631_v13, 1  ;;  %v1440_v35 = vcombine.low %v224_v23, %v203_v17  ;;  %v1637_v38 = vld [vmem:[%s1892_s20 + $0x2c] ss:$0 sps:$4 sm:$0x11]  }
  0x34   : > { %v388_v36 = vshll.u32 %v1951_v26, 16  ;;  %v1960_v37 = vcombine.low %v1362_v27, %v1363_v28  ;;  %v759_v39 = vsel %vm497_vm0, %v757_v24, %v758_v22  ;;  %v896_v40 = vrot.slane %v894_v30, 1  ;;  %v1394_v49 = vld [vmem:[%s1892_s20 + $0x30] sm:$0xf]  ;;  %v1395_v50 = vld [vmem:[%s1892_s20 + $0x34] sm:$0xf] }
  0x35   : > { %v641_v29 = vsel %vm360_vm1, %v636_v21, %v640_v15  ;;  %v386_v41 = vshrl.u32 %v1951_v26, 16  ;;  %v393_v43 = vshll.u32 %v1633_v31, 16  ;;  %v892_v45 = vor.u32 %v891_v32, %v887_v25  ;;  %v1384_v57 = vld [vmem:[%s1892_s20 + $0x24] sm:$0xe]  ;;  %v1416_v58 = vld [vmem:[%s1892_s20 + $0x30] sm:$0xe] }
  0x36   : > { %v645_v44 = vshll.u32 %v1960_v37, 16  ;;  %v1015_v46 = vsel %vm497_vm0, %v1013_v33, %v1014_v34  ;;  %v504_v47 = vrot.slane %v1440_v35, 1  ;;  %v505_v48 = vrot.slane %v1633_v31, 1  ;;  %v204_v0 = vld [vmem:[%s1892_s20 + $0x24] sm:$0xf] }
  0x37   : > { %459 = vrot.lane.b32.xlu0 %v384_v20, %s1787_s4  ;;  %716 = vrot.lane.b32.xlu1 %v641_v29, %s1789_s6  ;;  %v390_v51 = vrot.slane %v388_v36, 1  ;;  %v643_v52 = vshrl.u32 %v1960_v37, 16  ;;  %v650_v54 = vshll.u32 %v1637_v38, 16  ;;  %v897_v55 = vsel %vm360_vm1, %v892_v45, %v896_v40  ;;  %v205_v1 = vld [vmem:[%s1892_s20 + $0x28] sm:$0xf] }
  0x38   : > { %v647_v53 = vrot.slane %v645_v44, 1  ;;  %v395_v56 = vrot.slane %v393_v43, 1  ;;  %v1472_v59 = vcombine.low %v1394_v49, %v1395_v50  ;;  %v506_v61 = vsel %vm497_vm0, %v504_v47, %v505_v48  ;;  %v1364_v2 = vld [vmem:[%s1892_s20 + $0x30] sm:$0xf]  ;;  %v1982_v3 = vld [vmem:[%s1892_s20 + $0x34] sm:$0xf] }
  0x39   : > { %v391_v60 = vor.u32 %v390_v51, %v386_v41  ;;  %v652_v63 = vrot.slane %v650_v54, 1  ;;  %v1464_v4 = vcombine.low %v1384_v57, %v1363_v28  ;;  %v1488_v5 = vcombine.low %v1416_v58, %v1395_v50  ;;  %v1640_v6 = vld [vmem:[%s1892_s20 + $0x38] ss:$0 sps:$4 sm:$0x11]   ;;  %v1396_v36 = vld [vmem:[%s1892_s20 + $0x3c] sm:$0xf] }
  0x3a   : > { %v901_v7 = vshll.u32 %v1472_v59, 16  ;;  %v1989_v10 = vcombine.low %v204_v0, %v205_v1  ;;  %v1993_v13 = vcombine.low %v1364_v2, %v1982_v3  ;;  %v1790_v14 = vmov 0.0   ;;  %v1642_v16 = vld [vmem:[%s1892_s20 + $0x2c] ss:$0 sps:$4 sm:$0x11]  }
  0x3b   : > { %580 = vrot.lane.b32.xlu0 %v1447_v62, %s1782_s21  ;;  %836 = vrot.lane.b32.xlu1 %v1471_v12, %s1784_s27  ;;  %v648_v62 = vor.u32 %v647_v53, %v643_v52  ;;  %v396_v8 = vsel %vm360_vm1, %v391_v60, %v395_v56  ;;  %v225_v12 = vld [vmem:[%s1892_s20 + $0x24] sm:$0xe]  ;;  %v761_v15 = vrot.slane %v1637_v38, 1  ;;  %v760_v17 = vrot.slane %v1464_v4, 1  ;;  %v1397_v43 = vld [vmem:[%s1892_s20 + $0x40] sm:$0xf] }
  0x3c   : > { %1509 = vmatprep.subr.bf16.mxu0 %v1790_v14  ;;  %v906_v18 = vshll.u32 %v1640_v6, 16  ;;  %v1016_v19 = vrot.slane %v1488_v5, 1  ;;  %v1017_v20 = vrot.slane %v1640_v6, 1  ;;  %v899_v21 = vshrl.u32 %v1472_v59, 16  ;;  %v206_v52 = vld [vmem:[%s1892_s20 + $0x30] sm:$0xf]  ;;  %1525 = vmatprep.mubr.msk.bf16.mxu0 %vm1791_vm2, %v1790_v14 }
  0x3d   : > { %v653_v9 = vsel %vm360_vm1, %v648_v62, %v652_v63  ;;  %v903_v22 = vrot.slane %v901_v7, 1  ;;  %v1441_v23 = vcombine.low %v225_v12, %v205_v1  ;;  %v400_v24 = vshll.u32 %v1989_v10, 16  ;;  %v1646_v27 = vld [vmem:[%s1892_s20 + $0x38] ss:$0 sps:$4 sm:$0x11]  }
  0x3e   : > { %v657_v25 = vshll.u32 %v1993_v13, 16  ;;  %v762_v28 = vsel %vm497_vm0, %v760_v17, %v761_v15  ;;  %v908_v29 = vrot.slane %v906_v18, 1  ;;  %v1018_v30 = vsel %vm497_vm0, %v1016_v19, %v1017_v20  ;;  %v207_v54 = vld [vmem:[%s1892_s20 + $0x34] sm:$0xf]  ;;  %v2022_v56 = vld [vmem:[%s1892_s20 + $0x40] sm:$0xf] }
  0x3f   : > { %780 = vrot.lane.b32.xlu0 %v759_v39, %s1785_s28  ;;  %1036 = vrot.lane.b32.xlu1 %v1015_v46, %s1786_s29  ;;  %v405_v31 = vshll.u32 %v1642_v16, 16  ;;  %v904_v32 = vor.u32 %v903_v22, %v899_v21  ;;  %v398_v33 = vshrl.u32 %v1989_v10, 16  ;;  %v507_v34 = vrot.slane %v1441_v23, 1  ;;  %v1417_v46 = vld [vmem:[%s1892_s20 + $0x3c] sm:$0xe] }
  0x40   : > { %v508_v35 = vrot.slane %v1642_v16, 1  ;;  %v402_v38 = vrot.slane %v400_v24, 1  ;;  %v655_v39 = vshrl.u32 %v1993_v13, 16  ;;  %v659_v40 = vrot.slane %v657_v25, 1  ;;  %v226_v63 = vld [vmem:[%s1892_s20 + $0x30] sm:$0xe] }
  0x41   : > { %v662_v41 = vshll.u32 %v1646_v27, 16  ;;  %v909_v44 = vsel %vm360_vm1, %v904_v32, %v908_v29  ;;  %v407_v45 = vrot.slane %v405_v31, 1  ;;  %v1473_v47 = vcombine.low %v1396_v36, %v1397_v43  ;;  %v1649_v58 = vld [vmem:[%s1892_s20 + $0x44] ss:$0 sps:$4 sm:$0x11]  }
  0x42   : > { %v403_v48 = vor.u32 %v402_v38, %v398_v33  ;;  %v509_v49 = vsel %vm497_vm0, %v507_v34, %v508_v35  ;;  %v660_v50 = vor.u32 %v659_v40, %v655_v39  ;;  %v1489_v57 = vcombine.low %v1417_v46, %v1397_v43  ;;  %v1655_v16 = vld [vmem:[%s1892_s20 + $0x44] ss:$0 sps:$4 sm:$0x11]   ;;  %v1398_v25 = vld [vmem:[%s1892_s20 + $0x48] sm:$0xf] }
  0x43   : > { %972 = vrot.lane.b32.xlu0 %v897_v55, %s1788_s5  ;;  %526 = vrot.lane.b32.xlu1 %v506_v61, %s1783_s24  ;;  %v664_v51 = vrot.slane %v662_v41, 1  ;;  %v1366_v55 = vld [vmem:[%s1892_s20 + $0x3c] sm:$0xf]  ;;  %v2029_v62 = vcombine.low %v206_v52, %v207_v54  ;;  %v764_v2 = vrot.slane %v1646_v27, 1  ;;  %v918_v4 = vshll.u32 %v1649_v58, 16 }
  0x44   : > { %v408_v60 = vsel %vm360_vm1, %v403_v48, %v407_v45  ;;  %v2033_v0 = vcombine.low %v1366_v55, %v2022_v56  ;;  %v1019_v5 = vrot.slane %v1489_v57, 1  ;;  %v1020_v6 = vrot.slane %v1649_v58, 1  ;;  %v1399_v31 = vld [vmem:[%s1892_s20 + $0x4c] sm:$0xf]  ;;  %v1386_v32 = vld [vmem:[%s1892_s20 + $0x3c] sm:$0xe] }
  0x45   : > { %v665_v61 = vsel %vm360_vm1, %v660_v50, %v664_v51  ;;  %v412_v12 = vshll.u32 %v2029_v62, 16  ;;  %v920_v18 = vrot.slane %v918_v4, 1  ;;  %v410_v20 = vshrl.u32 %v2029_v62, 16  ;;  %v1418_v34 = vld [vmem:[%s1892_s20 + $0x48] sm:$0xe] }
  0x46   : > { %v669_v15 = vshll.u32 %v2033_v0, 16  ;;  %v1021_v19 = vsel %vm497_vm0, %v1019_v5, %v1020_v6  ;;  %v1474_v35 = vcombine.low %v1398_v25, %v1399_v31  ;;  %v208_v41 = vld [vmem:[%s1892_s20 + $0x3c] sm:$0xf]  ;;  %v209_v43 = vld [vmem:[%s1892_s20 + $0x40] sm:$0xf]  ;;  %v1490_v46 = vcombine.low %v1418_v34, %v1399_v31 }
  0x47   : > { %461 = vrot.lane.b32.xlu0 %v396_v8, %s1787_s4  ;;  %718 = vrot.lane.b32.xlu1 %v653_v9, %s1789_s6  ;;  %v1651_v8 = vld [vmem:[%s1892_s20 + $0x38] ss:$0 sps:$4 sm:$0x11]   ;;  %v1442_v9 = vcombine.low %v226_v63, %v207_v54  ;;  %v414_v27 = vrot.slane %v412_v12, 1  ;;  %v2061_v45 = vld [vmem:[%s1892_s20 + $0x4c] sm:$0xf]  ;;  %v2068_v51 = vcombine.low %v208_v41, %v209_v43 }
  0x48   : > { %v417_v22 = vshll.u32 %v1651_v8, 16  ;;  %v511_v24 = vrot.slane %v1651_v8, 1  ;;  %v671_v29 = vrot.slane %v669_v15, 1  ;;  %v925_v48 = vshll.u32 %v1474_v35, 16  ;;  %v227_v52 = vld [vmem:[%s1892_s20 + $0x3c] sm:$0xe] }
  0x49   : > { %v510_v23 = vrot.slane %v1442_v9, 1  ;;  %v415_v36 = vor.u32 %v414_v27, %v410_v20  ;;  %v767_v55 = vrot.slane %v1655_v16, 1  ;;  %v1022_v57 = vrot.slane %v1490_v46, 1  ;;  %v210_v31 = vld [vmem:[%s1892_s20 + $0x48] sm:$0xf] }
  0x4a   : > { %v419_v33 = vrot.slane %v417_v22, 1  ;;  %v1443_v63 = vcombine.low %v227_v52, %v209_v43  ;;  %v422_v9 = vshrl.u32 %v2068_v51, 16  ;;  %v2100_v34 = vld [vmem:[%s1892_s20 + $0x58] sm:$0xf]  ;;  %v228_v43 = vld [vmem:[%s1892_s20 + $0x48] sm:$0xe] }
  0x4b   : > { %582 = vrot.lane.b32.xlu0 %v1960_v37, %s1782_s21  ;;  %838 = vrot.lane.b32.xlu1 %v1472_v59, %s1784_s27  ;;  %v1385_v37 = vld [vmem:[%s1892_s20 + $0x30] sm:$0xe]  ;;  %v913_v59 = vshll.u32 %v1473_v47, 16  ;;  %v512_v38 = vsel %vm497_vm0, %v510_v23, %v511_v24  ;;  %v1419_v24 = vld [vmem:[%s1892_s20 + $0x54] sm:$0xe] }
  0x4c   : > { %v1465_v53 = vcombine.low %v1385_v37, %v1982_v3  ;;  %v911_v3 = vshrl.u32 %v1473_v47, 16  ;;  %v1466_v37 = vcombine.low %v1386_v32, %v2022_v56  ;;  %v513_v12 = vrot.slane %v1443_v63, 1 }
  0x4d   : > { %v915_v7 = vrot.slane %v913_v59, 1  ;;  %v1660_v59 = vld [vmem:[%s1892_s20 + $0x44] ss:$0 sps:$4 sm:$0x11]  }
  0x4e   : > { %v763_v1 = vrot.slane %v1465_v53, 1  ;;  %v766_v54 = vrot.slane %v1466_v37, 1  ;;  %v514_v15 = vrot.slane %v1660_v59, 1 }
  0x4f   : > { %782 = vrot.lane.b32.xlu0 %v762_v28, %s1785_s28  ;;  %1038 = vrot.lane.b32.xlu1 %v1018_v30, %s1786_s29  ;;  %v916_v21 = vor.u32 %v915_v7, %v911_v3  ;;  %v667_v28 = vshrl.u32 %v2033_v0, 16  ;;  %v674_v30 = vshll.u32 %v1655_v16, 16  ;;  %v1664_v3 = vld [vmem:[%s1892_s20 + $0x50] ss:$0 sps:$4 sm:$0x11]   ;;  %v429_v7 = vshll.u32 %v1660_v59, 16 }
  0x50   : > { %v765_v17 = vsel %vm497_vm0, %v763_v1, %v764_v2  ;;  %v424_v1 = vshll.u32 %v2068_v51, 16  ;;  %v768_v4 = vsel %vm497_vm0, %v766_v54, %v767_v55  ;;  %v1400_v16 = vld [vmem:[%s1892_s20 + $0x54] sm:$0xf]  ;;  %v686_v20 = vshll.u32 %v1664_v3, 16 }
  0x51   : > { %v672_v39 = vor.u32 %v671_v29, %v667_v28  ;;  %v676_v40 = vrot.slane %v674_v30, 1  ;;  %v431_v23 = vrot.slane %v429_v7, 1  ;;  %v515_v28 = vsel %vm497_vm0, %v513_v12, %v514_v15 }
  0x52   : > { %v688_v30 = vrot.slane %v686_v20, 1 }
  0x53   : > { %974 = vrot.lane.b32.xlu0 %v909_v44, %s1788_s5  ;;  %528 = vrot.lane.b32.xlu1 %v509_v49, %s1783_s24  ;;  %v1368_v44 = vld [vmem:[%s1892_s20 + $0x48] sm:$0xf]  ;;  %v420_v49 = vsel %vm360_vm1, %v415_v36, %v419_v33  ;;  %v677_v50 = vsel %vm360_vm1, %v672_v39, %v676_v40  ;;  %v1370_v33 = vld [vmem:[%s1892_s20 + $0x54] sm:$0xf] }
  0x54   : > { %v2072_v53 = vcombine.low %v1368_v44, %v2061_v45  ;;  %v1667_v36 = vld [vmem:[%s1892_s20 + $0x5c] ss:$0 sps:$4 sm:$0x11]   ;;  %v2111_v37 = vcombine.low %v1370_v33, %v2100_v34 }
  0x55   : > { %v942_v46 = vshll.u32 %v1667_v36, 16 }
  0x56   : > { %v681_v2 = vshll.u32 %v2072_v53, 16 }
  0x57   : > { %463 = vrot.lane.b32.xlu0 %v408_v60, %s1787_s4  ;;  %720 = vrot.lane.b32.xlu1 %v665_v61, %s1789_s6  ;;  %v923_v60 = vshrl.u32 %v1474_v35, 16  ;;  %v927_v61 = vrot.slane %v925_v48, 1  ;;  %v1026_v48 = vrot.slane %v1667_v36, 1  ;;  %v944_v59 = vrot.slane %v942_v46, 1 }
  0x59   : > { %v928_v8 = vor.u32 %v927_v61, %v923_v60 }
  0x5b   : > { %584 = vrot.lane.b32.xlu0 %v1993_v13, %s1782_s21  ;;  %840 = vrot.lane.b32.xlu1 %v1473_v47, %s1784_s27  ;;  %v921_v13 = vsel %vm360_vm1, %v916_v21, %v920_v18  ;;  %v1658_v47 = vld [vmem:[%s1892_s20 + $0x50] ss:$0 sps:$4 sm:$0x11]   ;;  %v679_v18 = vshrl.u32 %v2072_v53, 16  ;;  %v1401_v21 = vld [vmem:[%s1892_s20 + $0x58] sm:$0xf] }
  0x5c   : > { %v930_v56 = vshll.u32 %v1658_v47, 16  ;;  %v1023_v58 = vrot.slane %v1658_v47, 1  ;;  %v1475_v25 = vcombine.low %v1400_v16, %v1401_v21  ;;  %v1420_v16 = vld [vmem:[%s1892_s20 + $0x60] sm:$0xe] }
  0x5e   : > { %v932_v5 = vrot.slane %v930_v56, 1  ;;  %v1024_v6 = vsel %vm497_vm0, %v1022_v57, %v1023_v58  ;;  %v693_v56 = vshll.u32 %v2111_v37, 16  ;;  %v1673_v57 = vld [vmem:[%s1892_s20 + $0x5c] ss:$0 sps:$4 sm:$0x11]  }
  0x5f   : > { %784 = vrot.lane.b32.xlu0 %v765_v17, %s1785_s28  ;;  %1040 = vrot.lane.b32.xlu1 %v1021_v19, %s1786_s29  ;;  %v426_v17 = vrot.slane %v424_v1, 1  ;;  %v683_v19 = vrot.slane %v681_v2, 1 }
  0x60   : > { %v933_v22 = vsel %vm360_vm1, %v928_v8, %v932_v5  ;;  %v695_v7 = vrot.slane %v693_v56, 1  ;;  %v698_v8 = vshll.u32 %v1673_v57, 16 }
  0x61   : > { %v427_v27 = vor.u32 %v426_v17, %v422_v9  ;;  %v684_v29 = vor.u32 %v683_v19, %v679_v18  ;;  %v1403_v9 = vld [vmem:[%s1892_s20 + $0x64] sm:$0xf] }
  0x63   : > { %976 = vrot.lane.b32.xlu0 %v921_v13, %s1788_s5  ;;  %530 = vrot.lane.b32.xlu1 %v512_v38, %s1783_s24  ;;  %v211_v13 = vld [vmem:[%s1892_s20 + $0x4c] sm:$0xf]  ;;  %v937_v38 = vshll.u32 %v1475_v25, 16  ;;  %v432_v39 = vsel %vm360_vm1, %v427_v27, %v431_v23  ;;  %v689_v40 = vsel %vm360_vm1, %v684_v29, %v688_v30  ;;  %v213_v23 = vld [vmem:[%s1892_s20 + $0x58] sm:$0xf]  ;;  %v1492_v27 = vcombine.low %v1420_v16, %v1403_v9 }
  0x64   : > { %v2107_v41 = vcombine.low %v210_v31, %v211_v13  ;;  %v1444_v54 = vcombine.low %v228_v43, %v211_v13  ;;  %v229_v13 = vld [vmem:[%s1892_s20 + $0x54] sm:$0xe] }
  0x65   : > { %v939_v52 = vrot.slane %v937_v38, 1  ;;  %v1028_v38 = vrot.slane %v1492_v27, 1 }
  0x66   : > { %v436_v55 = vshll.u32 %v2107_v41, 16  ;;  %v434_v1 = vshrl.u32 %v2107_v41, 16  ;;  %v516_v2 = vrot.slane %v1444_v54, 1 }
  0x67   : > { %465 = vrot.lane.b32.xlu0 %v420_v49, %s1787_s4  ;;  %722 = vrot.lane.b32.xlu1 %v677_v50, %s1789_s6  ;;  %v1669_v49 = vld [vmem:[%s1892_s20 + $0x50] ss:$0 sps:$4 sm:$0x11]   ;;  %v935_v50 = vshrl.u32 %v1475_v25, 16 }
  0x68   : > { %v441_v61 = vshll.u32 %v1669_v49, 16  ;;  %v438_v5 = vrot.slane %v436_v55, 1 }
  0x69   : > { %v940_v63 = vor.u32 %v939_v52, %v935_v50 }
  0x6a   : > { %v443_v15 = vrot.slane %v441_v61, 1  ;;  %v439_v18 = vor.u32 %v438_v5, %v434_v1  ;;  %v1404_v1 = vld [vmem:[%s1892_s20 + $0x6c] sm:$0xf] }
  0x6b   : > { %586 = vrot.lane.b32.xlu0 %v2033_v0, %s1782_s21  ;;  %842 = vrot.lane.b32.xlu1 %v1474_v35, %s1784_s27  ;;  %v1387_v0 = vld [vmem:[%s1892_s20 + $0x48] sm:$0xe]  ;;  %v1491_v35 = vcombine.low %v1419_v24, %v1401_v21  ;;  %v945_v12 = vsel %vm360_vm1, %v940_v63, %v944_v59  ;;  %v700_v21 = vrot.slane %v698_v8, 1  ;;  %v1372_v24 = vld [vmem:[%s1892_s20 + $0x60] sm:$0xf] }
  0x6c   : > { %v1467_v32 = vcombine.low %v1387_v0, %v2061_v45  ;;  %v770_v45 = vrot.slane %v1664_v3, 1  ;;  %v517_v3 = vrot.slane %v1669_v49, 1  ;;  %v212_v0 = vld [vmem:[%s1892_s20 + $0x54] sm:$0xf]  ;;  %v444_v30 = vsel %vm360_vm1, %v439_v18, %v443_v15 }
  0x6d   : > { %v1025_v47 = vrot.slane %v1491_v35, 1  ;;  %v773_v35 = vrot.slane %v1673_v57, 1  ;;  %v1685_v15 = vld [vmem:[%s1892_s20 + $0x74] ss:$0 sps:$4 sm:$0x11]  }
  0x6e   : > { %v769_v44 = vrot.slane %v1467_v32, 1  ;;  %v518_v19 = vsel %vm497_vm0, %v516_v2, %v517_v3  ;;  %v2146_v32 = vcombine.low %v212_v0, %v213_v23  ;;  %v1405_v2 = vld [vmem:[%s1892_s20 + $0x70] sm:$0xf] }
  0x6f   : > { %786 = vrot.lane.b32.xlu0 %v768_v4, %s1785_s28  ;;  %1042 = vrot.lane.b32.xlu1 %v1024_v6, %s1786_s29  ;;  %v1027_v60 = vsel %vm497_vm0, %v1025_v47, %v1026_v48  ;;  %v1402_v4 = vld [vmem:[%s1892_s20 + $0x60] sm:$0xf]  ;;  %v691_v6 = vshrl.u32 %v2111_v37, 16  ;;  %v1682_v48 = vld [vmem:[%s1892_s20 + $0x68] ss:$0 sps:$4 sm:$0x11]  }
  0x70   : > { %v771_v58 = vsel %vm497_vm0, %v769_v44, %v770_v45  ;;  %v1476_v17 = vcombine.low %v1402_v4, %v1403_v9  ;;  %v1445_v45 = vcombine.low %v229_v13, %v213_v23  ;;  %v448_v46 = vshll.u32 %v2146_v32, 16 }
  0x71   : > { %v696_v20 = vor.u32 %v695_v7, %v691_v6  ;;  %v446_v56 = vshrl.u32 %v2146_v32, 16  ;;  %v710_v63 = vshll.u32 %v1682_v48, 16  ;;  %v1389_v6 = vld [vmem:[%s1892_s20 + $0x60] sm:$0xe]  ;;  %v1477_v9 = vcombine.low %v1404_v1, %v1405_v2 }
  0x72   : > { %v949_v29 = vshll.u32 %v1476_v17, 16  ;;  %v947_v43 = vshrl.u32 %v1476_v17, 16  ;;  %v519_v57 = vrot.slane %v1445_v45, 1  ;;  %v450_v59 = vrot.slane %v448_v46, 1  ;;  %v1187_v45 = vld [vmem:[%s2346_s2] sm:$0xff] }
  0x73   : > { %978 = vrot.lane.b32.xlu0 %v933_v22, %s1788_s5  ;;  %532 = vrot.lane.b32.xlu1 %v515_v28, %s1783_s24  ;;  %v1676_v28 = vld [vmem:[%s1892_s20 + $0x68] ss:$0 sps:$4 sm:$0x11]   ;;  %v701_v31 = vsel %vm360_vm1, %v696_v20, %v700_v21  ;;  %v712_v8 = vrot.slane %v710_v63, 1  ;;  %v961_v18 = vshll.u32 %v1477_v9, 16  ;;  %v776_v0 = vrot.slane %v1682_v48, 1 }
  0x74   : > { %v954_v36 = vshll.u32 %v1676_v28, 16  ;;  %v951_v44 = vrot.slane %v949_v29, 1  ;;  %v451_v5 = vor.u32 %v450_v59, %v446_v56  ;;  %v959_v23 = vshrl.u32 %v1477_v9, 16 }
  0x76   : > { %v956_v50 = vrot.slane %v954_v36, 1  ;;  %v952_v55 = vor.u32 %v951_v44, %v947_v43 }
  0x77   : > { %467 = vrot.lane.b32.xlu0 %v432_v39, %s1787_s4  ;;  %724 = vrot.lane.b32.xlu1 %v689_v40, %s1789_s6  ;;  %v1029_v39 = vrot.slane %v1676_v28, 1  ;;  %v1678_v40 = vld [vmem:[%s1892_s20 + $0x5c] ss:$0 sps:$4 sm:$0x11]   ;;  %v1032_v28 = vrot.slane %v1685_v15, 1 }
  0x78   : > { %v453_v54 = vshll.u32 %v1678_v40, 16 }
  0x79   : > { %v1030_v52 = vsel %vm497_vm0, %v1028_v38, %v1029_v39 }
  0x7a   : > { %v455_v3 = vrot.slane %v453_v54, 1 }
  0x7b   : > { %588 = vrot.lane.b32.xlu0 %v2072_v53, %s1782_s21  ;;  %844 = vrot.lane.b32.xlu1 %v1475_v25, %s1784_s27  ;;  %v1388_v53 = vld [vmem:[%s1892_s20 + $0x54] sm:$0xe]  ;;  %v2139_v25 = vld [vmem:[%s1892_s20 + $0x64] sm:$0xf] }
  0x7c   : > { %v1468_v22 = vcombine.low %v1388_v53, %v2100_v34  ;;  %v2150_v33 = vcombine.low %v1372_v24, %v2139_v25  ;;  %v1421_v53 = vld [vmem:[%s1892_s20 + $0x6c] sm:$0xe]  ;;  %v456_v16 = vsel %vm360_vm1, %v451_v5, %v455_v3  ;;  %v963_v24 = vrot.slane %v961_v18, 1  ;;  %s1356_s20 = sshll.u32 %s185_s11, 3 }
  0x7e   : > { %v772_v34 = vrot.slane %v1468_v22, 1  ;;  %v705_v47 = vshll.u32 %v2150_v33, 16  ;;  %v966_v22 = vshll.u32 %v1685_v15, 16 }
  0x7f   : > { %788 = vrot.lane.b32.xlu0 %v771_v58, %s1785_s28  ;;  %1044 = vrot.lane.b32.xlu1 %v1027_v60, %s1786_s29  ;;  %v520_v58 = vrot.slane %v1678_v40, 1  ;;  %v703_v60 = vshrl.u32 %v2150_v33, 16  ;;  %v1792_v40 = vmov 0  }
  0x80   : > { %v774_v49 = vsel %vm497_vm0, %v772_v34, %v773_v35  ;;  %v707_v61 = vrot.slane %v705_v47, 1  ;;  %v968_v13 = vrot.slane %v966_v22, 1  ;;  %1613 = vset.pattern.permute.xlu0 %v1792_v40 }
  0x81   : > { %v521_v4 = vsel %vm497_vm0, %v519_v57, %v520_v58 }
  0x82   : > { %v708_v7 = vor.u32 %v707_v61, %v703_v60 }
  0x83   : > { %980 = vrot.lane.b32.xlu0 %v945_v12, %s1788_s5  ;;  %534 = vrot.lane.b32.xlu1 %v518_v19, %s1783_s24  ;;  %v1469_v12 = vcombine.low %v1389_v6, %v2139_v25  ;;  %v1493_v19 = vcombine.low %v1421_v53, %v1405_v2 }
  0x85   : > { %v775_v21 = vrot.slane %v1469_v12, 1  ;;  %v1031_v27 = vrot.slane %v1493_v19, 1 }
  0x87   : > { %469 = vrot.lane.b32.xlu0 %v444_v30, %s1787_s4  ;;  %726 = vrot.lane.b32.xlu1 %v701_v31, %s1789_s6  ;;  %v777_v30 = vsel %vm497_vm0, %v775_v21, %v776_v0  ;;  %v964_v31 = vor.u32 %v963_v24, %v959_v23  ;;  %v1033_v34 = vsel %vm497_vm0, %v1031_v27, %v1032_v28 }
  0x89   : > { %v969_v38 = vsel %vm360_vm1, %v964_v31, %v968_v13 }
  0x8b   : > { %590 = vrot.lane.b32.xlu0 %v2111_v37, %s1782_s21  ;;  %846 = vrot.lane.b32.xlu1 %v1476_v17, %s1784_s27  ;;  %v957_v37 = vsel %vm360_vm1, %v952_v55, %v956_v50  ;;  %v713_v17 = vsel %vm360_vm1, %v708_v7, %v712_v8 }
  0x8f   : > { %790 = vrot.lane.b32.xlu0 %v774_v49, %s1785_s28  ;;  %1046 = vrot.lane.b32.xlu1 %v1030_v52, %s1786_s29 }
  0x93   : > { %982 = vrot.lane.b32.xlu0 %v957_v37, %s1788_s5  ;;  %536 = vrot.lane.b32.xlu1 %v521_v4, %s1783_s24 }
  0x95   : > { %v579_v20 = vpop.permute.xlu1 %578 }
  0x97   : > { %471 = vrot.lane.b32.xlu0 %v456_v16, %s1787_s4  ;;  %728 = vrot.lane.b32.xlu1 %v713_v17, %s1789_s6 }
  0x99   : > { %v523_v25 = vpop.permute.xlu0 %522  ;;  %v835_v29 = vpop.permute.xlu1 %834 }
  0x9b   : > { %592 = vrot.lane.b32.xlu0 %v2150_v33, %s1782_s21  ;;  %848 = vrot.lane.b32.xlu1 %v1477_v9, %s1784_s27  ;;  %s1496_s21 = sshll.u32 %s1768_s16, 1 }
  0x9c   : > { %s1266_s24 = sadd.s32 %s1764_s15, %s1496_s21  ;;  %s1255_s15 = scalar_lea.sflag [#allocation3], %s185_s11 }
  0x9d   : > { %v779_v35 = vpop.permute.xlu0 %778  ;;  %v1035_v36 = vpop.permute.xlu1 %1034  ;;  %s1497_s27 = sshll.u32 %s1266_s24, 7 }
  0x9e   : > { %s2291_s6 = scalar_lea.hbm %s2347_s3, %s1497_s27 }
  0x9f   : > { %792 = vrot.lane.b32.xlu0 %v777_v30, %s1785_s28  ;;  %1048 = vrot.lane.b32.xlu1 %v1033_v34, %s1786_s29  ;;  %s187_s28 = scalar_lea.vmem [#allocation2], %s1356_s20 }
  0xa0   : > { %s1270_s29 = sshll.u32 %s187_s28, 4  ;;  %s2293_s29 = int_to_ptr.vmem [resolvable:$true] %s1270_s29 }
  0xa1   : > { %v458_v39 = vpop.permute.xlu0 %457  ;;  %v525_v33 = vpop.permute.xlu1 %524  ;;  %s1686_s16 = scalar_lea.vmem %s2293_s29, 128  ;;  %p1693_p4 = scmp.lt.s32.totalorder %s2293_s29, %s1691_s8 }
  0xa2   : > { %v1052_v43 = vsel %vm1050_vm3, %v1906_v11, %v458_v39  ;;  %p1687_p0 = scmp.ne.s32.totalorder %s2293_s29, %s1686_s16  ;;  %p1694_p5 = scmp.lt.s32.totalorder %s1692_s9, %s1686_s16 }
  0xa3   : > { %v1069_v44 = vsel %vm1067_vm4, %v1052_v43, %v523_v25  ;;  %984 = vrot.lane.b32.xlu0 %v969_v38, %s1788_s5 }
  0xa4   : > { %v1086_v48 = vsel %vm1084_vm5, %v1069_v44, %v579_v20  ;;  %p1688_p1 = pnand %p1687_p0, %p1865_p3  ;;  %p1695_p6 = por %p1694_p5, %p1693_p4 }
  0xa5   : > { %v971_v46 = vpop.permute.xlu0 %970  ;;  %v715_v47 = vpop.permute.xlu1 %714 }
  0xa6   : > { %v1103_v49 = vsel %vm1101_vm6, %v1086_v48, %v715_v47  ;;  %p1689_p2 = pneg %p1688_p1 }
  0xa7   : > { %v1120_v11 = vsel %vm1118_vm7, %v1103_v49, %v779_v35  ;;  %1190 = vperm.xlu0 %1613, %v1187_v45  }
  0xa8   : > { %v1137_v50 = vsel %vm1135_vm8, %v1120_v11, %v835_v29  ;;  %p1696_p7 = pnand %p1695_p6, %p1689_p2 }
  0xa9   : > { %v460_v52 = vpop.permute.xlu0 %459  ;;  %v1154_v54 = vsel %vm1152_vm9, %v1137_v50, %v971_v46  ;;  %v717_v55 = vpop.permute.xlu1 %716 }
  0xaa   : > { %v1054_v56 = vsel %vm1050_vm3, %v1924_v42, %v460_v52  ;;  %v1171_v57 = vsel %vm1169_vm10, %v1154_v54, %v1035_v36 }
  0xab   : > { %v1197_v58 = vsel %vm1193_vm11, %v1171_v57, 0  ;;  %v1071_v59 = vsel %vm1067_vm4, %v1054_v56, %v525_v33 }
  0xac   : > { %1510 = vmatpush3.bf16.xpose.msra.mxu0 %v1197_v58 }
  0xad   : > { %v581_v60 = vpop.permute.xlu0 %580  ;;  %v837_v61 = vpop.permute.xlu1 %836  ;;  %1511 = vmatprep.subr.bf16.mxu0 %v1790_v14 }
  0xae   : > { %v1088_v63 = vsel %vm1084_vm5, %v1071_v59, %v581_v60 }
  0xaf   : > { %v1105_v1 = vsel %vm1101_vm6, %v1088_v63, %v717_v55 }
  0xb1   : > { %v781_v2 = vpop.permute.xlu0 %780  ;;  %v1037_v37 = vpop.permute.xlu1 %1036 }
  0xb2   : > { %v1122_v3 = vsel %vm1118_vm7, %v1105_v1, %v781_v2 }
  0xb3   : > { %v1139_v42 = vsel %vm1135_vm8, %v1122_v3, %v837_v61 }
  0xb5   : > { %v973_v4 = vpop.permute.xlu0 %972  ;;  %v527_v5 = vpop.permute.xlu1 %526 }
  0xb6   : > { %v1156_v6 = vsel %vm1152_vm9, %v1139_v42, %v973_v4 }
  0xb7   : > { %v1173_v7 = vsel %vm1169_vm10, %v1156_v6, %v1037_v37 }
  0xb8   : > { %v1199_v8 = vsel %vm1193_vm11, %v1173_v7, 0 }
  0xb9   : > { %1512 = vmatpush3.bf16.xpose.msra.mxu0 %v1199_v8  ;;  %v462_v9 = vpop.permute.xlu0 %461  ;;  %v719_v53 = vpop.permute.xlu1 %718 }
  0xba   : > { %v1056_v12 = vsel %vm1050_vm3, %v1951_v26, %v462_v9  ;;  %1513 = vmatprep.subr.bf16.mxu0 %v1790_v14 }
  0xbb   : > { %v1073_v15 = vsel %vm1067_vm4, %v1056_v12, %v527_v5 }
  0xbd   : > { %v583_v16 = vpop.permute.xlu0 %582  ;;  %v839_v17 = vpop.permute.xlu1 %838 }
  0xbe   : > { %v1090_v18 = vsel %vm1084_vm5, %v1073_v15, %v583_v16 }
  0xbf   : > { %v1107_v19 = vsel %vm1101_vm6, %v1090_v18, %v719_v53 }
  0xc1   : > { %v783_v20 = vpop.permute.xlu0 %782  ;;  %v1039_v21 = vpop.permute.xlu1 %1038 }
  0xc2   : > { %v1124_v0 = vsel %vm1118_vm7, %v1107_v19, %v783_v20 }
  0xc3   : > { %v1141_v22 = vsel %vm1135_vm8, %v1124_v0, %v839_v17 }
  0xc5   : > { %v975_v23 = vpop.permute.xlu0 %974  ;;  %v529_v24 = vpop.permute.xlu1 %528 }
  0xc6   : > { %v1158_v26 = vsel %vm1152_vm9, %v1141_v22, %v975_v23 }
  0xc7   : > { %v1175_v27 = vsel %vm1169_vm10, %v1158_v26, %v1039_v21 }
  0xc8   : > { %v1201_v28 = vsel %vm1193_vm11, %v1175_v27, 0 }
  0xc9   : > { %1514 = vmatpush3.bf16.xpose.msra.mxu0 %v1201_v28  ;;  %v464_v25 = vpop.permute.xlu0 %463  ;;  %v721_v29 = vpop.permute.xlu1 %720 }
  0xca   : > { %v1058_v30 = vsel %vm1050_vm3, %v1989_v10, %v464_v25  ;;  %1515 = vmatprep.subr.bf16.mxu0 %v1790_v14 }
  0xcb   : > { %v1075_v31 = vsel %vm1067_vm4, %v1058_v30, %v529_v24 }
  0xcd   : > { %v585_v13 = vpop.permute.xlu0 %584  ;;  %v841_v34 = vpop.permute.xlu1 %840 }
  0xce   : > { %v1092_v35 = vsel %vm1084_vm5, %v1075_v31, %v585_v13 }
  0xcf   : > { %v1109_v36 = vsel %vm1101_vm6, %v1092_v35, %v721_v29 }
  0xd1   : > { %v785_v38 = vpop.permute.xlu0 %784  ;;  %v1041_v39 = vpop.permute.xlu1 %1040 }
  0xd2   : > { %v1126_v33 = vsel %vm1118_vm7, %v1109_v36, %v785_v38 }
  0xd3   : > { %v1143_v40 = vsel %vm1135_vm8, %v1126_v33, %v841_v34 }
  0xd5   : > { %v977_v43 = vpop.permute.xlu0 %976  ;;  %v531_v44 = vpop.permute.xlu1 %530 }
  0xd6   : > { %v1160_v10 = vsel %vm1152_vm9, %v1143_v40, %v977_v43 }
  0xd7   : > { %v1177_v45 = vsel %vm1169_vm10, %v1160_v10, %v1041_v39 }
  0xd8   : > { %v1203_v46 = vsel %vm1193_vm11, %v1177_v45, 0 }
  0xd9   : > { %1516 = vmatpush3.bf16.xpose.msra.mxu0 %v1203_v46  ;;  %v466_v47 = vpop.permute.xlu0 %465  ;;  %v723_v48 = vpop.permute.xlu1 %722 }
  0xda   : > { %v1060_v49 = vsel %vm1050_vm3, %v2029_v62, %v466_v47  ;;  %1517 = vmatprep.subr.bf16.mxu0 %v1790_v14 }
  0xdb   : > { %v1077_v11 = vsel %vm1067_vm4, %v1060_v49, %v531_v44 }
  0xdd   : > { %v587_v50 = vpop.permute.xlu0 %586  ;;  %v843_v52 = vpop.permute.xlu1 %842 }
  0xde   : > { %v1094_v54 = vsel %vm1084_vm5, %v1077_v11, %v587_v50  ;;  %v1186_v11 = vld [vmem:[%s2345_s1] sm:$0xf] }
  0xdf   : > { %v1111_v55 = vsel %vm1101_vm6, %v1094_v54, %v723_v48 }
  0xe1   : > { %v787_v56 = vpop.permute.xlu0 %786  ;;  %v1043_v57 = vpop.permute.xlu1 %1042 }
  0xe2   : > { %v1128_v58 = vsel %vm1118_vm7, %v1111_v55, %v787_v56 }
  0xe3   : > { %v1145_v59 = vsel %vm1135_vm8, %v1128_v58, %v843_v52 }
  0xe5   : > { %v979_v60 = vpop.permute.xlu0 %978  ;;  %v533_v61 = vpop.permute.xlu1 %532 }
  0xe6   : > { %v1162_v62 = vsel %vm1152_vm9, %v1145_v59, %v979_v60 }
  0xe7   : > { %v1179_v63 = vsel %vm1169_vm10, %v1162_v62, %v1043_v57 }
  0xe8   : > { %v1205_v1 = vsel %vm1193_vm11, %v1179_v63, 0 }
  0xe9   : > { %1518 = vmatpush3.bf16.xpose.msra.mxu0 %v1205_v1  ;;  %v468_v2 = vpop.permute.xlu0 %467  ;;  %v725_v37 = vpop.permute.xlu1 %724 }
  0xea   : > { %v1062_v3 = vsel %vm1050_vm3, %v2068_v51, %v468_v2  ;;  %1519 = vmatprep.subr.bf16.mxu0 %v1790_v14 }
  0xeb   : > { %v1079_v42 = vsel %vm1067_vm4, %v1062_v3, %v533_v61 }
  0xed   : > { %v589_v4 = vpop.permute.xlu0 %588  ;;  %v845_v5 = vpop.permute.xlu1 %844 }
  0xee   : > { %v1096_v6 = vsel %vm1084_vm5, %v1079_v42, %v589_v4 }
  0xef   : > { %v1113_v7 = vsel %vm1101_vm6, %v1096_v6, %v725_v37 }
  0xf1   : > { %v789_v8 = vpop.permute.xlu0 %788  ;;  %v1045_v9 = vpop.permute.xlu1 %1044 }
  0xf2   : > { %v1130_v53 = vsel %vm1118_vm7, %v1113_v7, %v789_v8 }
  0xf3   : > { %v1147_v12 = vsel %vm1135_vm8, %v1130_v53, %v845_v5 }
  0xf5   : > { %v981_v15 = vpop.permute.xlu0 %980  ;;  %v535_v16 = vpop.permute.xlu1 %534 }
  0xf6   : > { %v1164_v51 = vsel %vm1152_vm9, %v1147_v12, %v981_v15 }
  0xf7   : > { %v1181_v17 = vsel %vm1169_vm10, %v1164_v51, %v1045_v9 }
  0xf8   : > { %v1207_v18 = vsel %vm1193_vm11, %v1181_v17, 0 }
  0xf9   : > { %1520 = vmatpush3.bf16.xpose.msra.mxu0 %v1207_v18  ;;  %v470_v19 = vpop.permute.xlu0 %469  ;;  %v727_v20 = vpop.permute.xlu1 %726 }
  0xfa   : > { %v1064_v21 = vsel %vm1050_vm3, %v2107_v41, %v470_v19  ;;  %1521 = vmatprep.subr.bf16.mxu0 %v1790_v14 }
  0xfb   : > { %v1081_v0 = vsel %vm1067_vm4, %v1064_v21, %v535_v16 }
  0xfd   : > { %v591_v22 = vpop.permute.xlu0 %590  ;;  %v847_v23 = vpop.permute.xlu1 %846 }
  0xfe   : > { %v1098_v24 = vsel %vm1084_vm5, %v1081_v0, %v591_v22 }
  0xff   : > { %v1115_v26 = vsel %vm1101_vm6, %v1098_v24, %v727_v20 }
 0x101   : > { %v791_v27 = vpop.permute.xlu0 %790  ;;  %v1047_v28 = vpop.permute.xlu1 %1046 }
 0x102   : > { %v1132_v25 = vsel %vm1118_vm7, %v1115_v26, %v791_v27 }
 0x103   : > { %v1149_v29 = vsel %vm1135_vm8, %v1132_v25, %v847_v23 }
 0x105   : > { %v983_v30 = vpop.permute.xlu0 %982  ;;  %v537_v31 = vpop.permute.xlu1 %536 }
 0x106   : > { %v1166_v41 = vsel %vm1152_vm9, %v1149_v29, %v983_v30 }
 0x107   : > { %v1183_v13 = vsel %vm1169_vm10, %v1166_v41, %v1047_v28 }
 0x108   : > { %v1209_v34 = vsel %vm1193_vm11, %v1183_v13, 0 }
 0x109   : > { %1522 = vmatpush3.bf16.xpose.msra.mxu0 %v1209_v34  ;;  %v472_v35 = vpop.permute.xlu0 %471  ;;  %v729_v36 = vpop.permute.xlu1 %728 }
 0x10a   : > { %v1066_v38 = vsel %vm1050_vm3, %v2146_v32, %v472_v35  ;;  %1523 = vmatprep.subr.bf16.mxu0 %v1790_v14 }
 0x10b   : > { %v1083_v39 = vsel %vm1067_vm4, %v1066_v38, %v537_v31 }
 0x10d   : > { %v593_v33 = vpop.permute.xlu0 %592  ;;  %v849_v43 = vpop.permute.xlu1 %848 }
 0x10e   : > { %v1100_v40 = vsel %vm1084_vm5, %v1083_v39, %v593_v33 }
 0x10f   : > { %v1117_v44 = vsel %vm1101_vm6, %v1100_v40, %v729_v36 }
 0x111   : > { %v793_v10 = vpop.permute.xlu0 %792  ;;  %v1049_v46 = vpop.permute.xlu1 %1048 }
 0x112   : > { %v1134_v45 = vsel %vm1118_vm7, %v1117_v44, %v793_v10 }
 0x113   : > { %v1151_v47 = vsel %vm1135_vm8, %v1134_v45, %v849_v43 }
 0x115   : > { %v985_v32 = vpop.permute.xlu0 %984 }
 0x116   : > { %v1168_v14 = vsel %vm1152_vm9, %v1151_v47, %v985_v32 }
 0x117   : > { %v1185_v48 = vsel %vm1169_vm10, %v1168_v14, %v1049_v46 }
 0x118   : > { %v1211_v49 = vsel %vm1193_vm11, %v1185_v48, 0 }
 0x119   : > { %1524 = vmatpush3.bf16.xpose.msra.mxu0 %v1211_v49 }
 0x120   : > { %1526 = vmatmul.mubr.msk.bf16.vlgmr.msra.gmra.mrb[0].mxu0 %vm1193_vm11, %v1186_v11 }
 0x126   : > { %v1191_v50 = vpop.permute.xlu0 %1190 }
 0x1f3   : > { %v1247_v52 = vpop.f32.mrb[0].mxu0 }
 0x1f4   : > { %v1248_v54 = vadd.f32 %v1247_v52, %v1191_v50  ;;  %v1527_v55 = vpop.f32.mrb[1].mxu0 }
 0x1f5   : > { %v1250_v56 = vpop.f32.mrb[2].mxu0 }
 0x1f6   : > { %1253 = vst [vmem:[%s187_s28] sm:$0xff] %v1248_v54  ;;  %v1528_v57 = vpop.f32.mrb[3].mxu0 }
 0x1f7   : > { %1699 = shalt.err (!%p1696_p7)
}
 0x1f8   : > { %s1700_s10 = scalar_lea.hbm %s2291_s6, 128  ;;  %s1704_s21 = scalar_lea.hbm %s2347_s3, 512 }
 0x1f9   : > { %p1701_p9 = scmp.ne.s32.totalorder %s2291_s6, %s1700_s10  ;;  %p1705_p12 = scmp.lt.u32.totalorder %s2291_s6, %s2347_s3 }
 0x1fa   : > { %p1706_p13 = scmp.lt.u32.totalorder %s1704_s21, %s1700_s10  ;;  %p1708_p1 = scmp.lt.u32.totalorder %s1700_s10, %s2291_s6 }
 0x1fb   : > { %p1702_p10 = pnand %p1701_p9, %p1865_p3 }
 0x1fc   : > { %p1707_p0 = por %p1706_p13, %p1705_p12 }
 0x1fd   : > { %p1703_p11 = pneg %p1702_p10 }
 0x1fe   : > { %p1709_p2 = por %p1708_p1, %p1707_p0 }
 0x200   : > { %p1710_p4 = pnand %p1709_p2, %p1703_p11 }
 0x202   : > { %1713 = shalt.err (!%p1710_p4)
}
 0x203   : > { %1531 = dma.vmem_to_hbm [thread:$0]  (%p1865_p3), %s2293_s29, 128, %s2291_s6, %s1255_s15  }
 0x204 PF: > { %p1537_p5 = scmp.ge.s32.totalorder %s1780_s19, 2  ;;  %s1282_s28 = sand.u32 1, %s1752_s12  }
 0x205   : > { %s1283_s4 = scalar_lea.sflag [#allocation3], %s1282_s28 }
 0x206   : > { %p1534_p6 = pnand %p1537_p5, %p1874_p8 }
 0x208   : > { %1747 = dma.done.wait (!%p1534_p6), %s1283_s4, 128  }
 0x209   : > { %1749 = vsyncadd (!%p1534_p6), %s1283_s4, 4294967168  ;;  %s16_s19 = sadd.s32 1, %s1780_s19   ;;  %s2350_s12 = smov %s1756_s13 }
 0x20a   : > { %p13_p7 = scmp.ge.s32.totalorder %s16_s19, 6   ;;  %s2351_s13 = smov %s1760_s14 }
 0x20b   : > { %s2352_s14 = smov %s1883_s30  ;;  %s2353_s15 = smov %s1772_s17 }
 0x20c   : > { %s2354_s16 = smov %s1776_s18  ;;  %s2355_s17 = smov %s2358_s22 }
 0x20d   : > { %s2356_s18 = smov %s2362_s23  ;;  %15 = sbr.rel (!%p13_p7) target bundleno = 5 (0x5), region = 69 }
 0x214   :  { %1288 = vsyncpa [#allocation3], 1 }
 0x215   :  { %1290 = vsyncpa [#allocation3 + $0x1], 1 }

</bundles_post_ra>
